<compile_context>
chip_gen: v7x
topology: tpu7x:2x2x1
jax: 0.10.0
libtpu: 0.0.40
codegen_flags: <defaults>
</compile_context>

<pallas_src>
import functools

import jax
import jax.numpy as jnp
from jax.experimental import pallas as pl
from jax.experimental.pallas import tpu as pltpu


def _round_up(v, m):
    return (v + m - 1) // m * m


_FUSED_MAX_N_PAD = 2048       # single-call fully VMEM-resident fast path
_RESIDENT_MAX_N_PAD = 16384   # keep Xs / G resident in VMEM up to this size


# ----------------------------------------------------------------------------
# Fused small-graph kernel: both GCN layers, everything VMEM-resident.
#   OUT = tanh( D^-1/2 A D^-1/2 relu( D^-1/2 A (D^-1/2 X) W1 + b1 ) W2 + b2 )
# ----------------------------------------------------------------------------
def _gcn_fused_kernel(a_ref, xs_ref, dinv_ref, w1_ref, b1_ref, w2_ref, b2_ref,
                      out_ref):
    agg = jnp.dot(a_ref[...], xs_ref[...], preferred_element_type=jnp.float32)
    agg = dinv_ref[...] * agg
    h = jnp.dot(agg.astype(jnp.bfloat16), w1_ref[...],
                preferred_element_type=jnp.float32) + b1_ref[...]
    h = jnp.maximum(h, 0.0)
    # TODO(synk): training-mode dropout would use pltpu.prng_seed +
    # pltpu.stateful_bernoulli here; inference path is identity.
    g = jnp.dot((dinv_ref[...] * h).astype(jnp.bfloat16), w2_ref[...],
                preferred_element_type=jnp.float32)
    agg2 = jnp.dot(a_ref[...], g.astype(jnp.bfloat16),
                   preferred_element_type=jnp.float32)
    out_ref[...] = jnp.tanh(dinv_ref[...] * agg2 + b2_ref[...])


# ----------------------------------------------------------------------------
# Tiled kernel 1:  G = D^-1/2 * relu( D^-1/2 (A @ Xs) @ W1 + b1 ) @ W2
# grid = (row tiles of A [parallel], reduction over A's columns [arbitrary])
# ----------------------------------------------------------------------------
def _gcn_layer1_kernel(tk, xs_resident, a_ref, xs_ref, dinv_ref, w1_ref, b1_ref,
                       w2_ref, g_ref, acc_ref):
    k = pl.program_id(1)

    @pl.when(k == 0)
    def _():
        acc_ref[...] = jnp.zeros_like(acc_ref)

    if xs_resident:
        start = pl.multiple_of(k * tk, tk)
        xs = xs_ref[pl.ds(start, tk), :]     # Xs is fully VMEM-resident
    else:
        xs = xs_ref[...]
    acc_ref[...] += jnp.dot(a_ref[...], xs, preferred_element_type=jnp.float32)

    @pl.when(k == pl.num_programs(1) - 1)
    def _():
        agg = dinv_ref[...] * acc_ref[...]                       # (TM, C_PAD) f32
        h = jnp.dot(agg.astype(jnp.bfloat16), w1_ref[...],
                    preferred_element_type=jnp.float32) + b1_ref[...]
        h = jnp.maximum(h, 0.0)
        # TODO(synk): training dropout omitted (inference path).
        g = jnp.dot((dinv_ref[...] * h).astype(jnp.bfloat16), w2_ref[...],
                    preferred_element_type=jnp.float32)
        g_ref[...] = g.astype(g_ref.dtype)


# ----------------------------------------------------------------------------
# Tiled kernel 2:  OUT = tanh( D^-1/2 * (A @ G) + b2 )
# ----------------------------------------------------------------------------
def _gcn_layer2_kernel(tk, g_resident, a_ref, g_ref, dinv_ref, b2_ref, out_ref,
                       acc_ref):
    k = pl.program_id(1)

    @pl.when(k == 0)
    def _():
        acc_ref[...] = jnp.zeros_like(acc_ref)

    if g_resident:
        start = pl.multiple_of(k * tk, tk)
        g = g_ref[pl.ds(start, tk), :]
    else:
        g = g_ref[...]
    acc_ref[...] += jnp.dot(a_ref[...], g, preferred_element_type=jnp.float32)

    @pl.when(k == pl.num_programs(1) - 1)
    def _():
        out_ref[...] = jnp.tanh(dinv_ref[...] * acc_ref[...] + b2_ref[...])


# ----------------------------------------------------------------------------
# Wrapper
# ----------------------------------------------------------------------------
def trigger_generator_forward(x, edge_index, w1, b1, w2, b2, *,
                              force_tiled=False):
    """x: [N, C_in] f32, edge_index: [2, E] int32 (src row 0, dst row 1)."""
    n, c_in = x.shape
    hidden = w1.shape[1]
    c_pad = _round_up(c_in, 128)
    h_pad = _round_up(hidden, 128)

    fused = (not force_tiled) and (_round_up(n, 128) <= _FUSED_MAX_N_PAD)
    tile = 128 if fused else 512
    n_pad = _round_up(n, tile)

    # ---- graph glue: A built directly in bf16, degrees via O(E) scatter ----
    # PyG GCNConv aggregates src -> dst, so A[i, j] = #edges j->i.
    src, dst = edge_index[0], edge_index[1]
    loop = jnp.arange(n, dtype=jnp.int32)
    one = jnp.bfloat16(1.0)
    adj = jnp.zeros((n_pad, n_pad), jnp.bfloat16).at[dst, src].add(one)
    # add_remaining_self_loops: diagonal -> max(existing self-loop count, 1)
    adj = adj.at[loop, loop].set(jnp.maximum(adj[loop, loop], one))

    deg = jnp.zeros((n_pad,), jnp.float32).at[dst].add(1.0)
    self_cnt = jnp.zeros((n_pad,), jnp.float32).at[dst].add(
        jnp.where(src == dst, 1.0, 0.0))
    deg = deg + jnp.where(self_cnt > 0.0, 0.0, 1.0)       # remaining self-loop
    deg = jnp.where(jnp.arange(n_pad) < n, deg, 0.0)       # mask padded nodes
    dinv = jnp.where(deg > 0.0, jax.lax.rsqrt(deg), 0.0)
    dinv_col = dinv[:, None]                                # (n_pad, 1) f32

    # ---- pad features / params to lane-dense widths -------------------------
    x_pad = jnp.zeros((n_pad, c_pad), jnp.float32).at[:n, :c_in].set(x)
    xs_bf = (dinv_col * x_pad).astype(jnp.bfloat16)         # col-scale folded in
    w1_bf = jnp.zeros((c_pad, h_pad), jnp.bfloat16).at[:c_in, :hidden].set(
        w1.astype(jnp.bfloat16))
    w2_bf = jnp.zeros((h_pad, c_pad), jnp.bfloat16).at[:hidden, :c_in].set(
        w2.astype(jnp.bfloat16))
    b1_p = jnp.zeros((1, h_pad), jnp.float32).at[:, :hidden].set(
        b1.reshape(1, hidden))
    b2_p = jnp.zeros((1, c_pad), jnp.float32).at[:, :c_in].set(
        b2.reshape(1, c_in))

    # ---- fused single-kernel fast path (small / medium graphs) --------------
    if fused:
        out_pad = pl.pallas_call(
            _gcn_fused_kernel,
            out_shape=jax.ShapeDtypeStruct((n_pad, c_pad), jnp.float32),
            in_specs=[pl.BlockSpec(memory_space=pltpu.MemorySpace.VMEM)] * 7,
            out_specs=pl.BlockSpec(memory_space=pltpu.MemorySpace.VMEM),
            compiler_params=pltpu.CompilerParams(
                vmem_limit_bytes=32 * 1024 * 1024),
        )(adj, xs_bf, dinv_col, w1_bf, b1_p, w2_bf, b2_p)
        return out_pad[:n, :c_in]

    # ---- tiled two-kernel path (large graphs) --------------------------------
    tk = tile
    # v7x: ensure >= 2 blocks along the "parallel" row axis (2 TensorCores).
    tm = tile if (n_pad // tile) >= 2 else tile // 2
    grid = (n_pad // tm, n_pad // tk)
    resident = n_pad <= _RESIDENT_MAX_N_PAD

    cparams = pltpu.CompilerParams(
        dimension_semantics=("parallel", "arbitrary"),
        vmem_limit_bytes=48 * 1024 * 1024,    # safe on v7x (64 MiB physical)
    )

    if resident:
        feat_spec = pl.BlockSpec((n_pad, c_pad), lambda i, k: (0, 0))
    else:
        feat_spec = pl.BlockSpec((tk, c_pad), lambda i, k: (k, 0))

    g = pl.pallas_call(
        functools.partial(_gcn_layer1_kernel, tk, resident),
        out_shape=jax.ShapeDtypeStruct((n_pad, c_pad), jnp.bfloat16),
        grid_spec=pltpu.PrefetchScalarGridSpec(
            num_scalar_prefetch=0,
            grid=grid,
            in_specs=[
                pl.BlockSpec((tm, tk), lambda i, k: (i, k)),        # A
                feat_spec,                                          # D^-1/2 X
                pl.BlockSpec((tm, 1), lambda i, k: (i, 0)),         # dinv rows
                pl.BlockSpec((c_pad, h_pad), lambda i, k: (0, 0)),  # W1
                pl.BlockSpec((1, h_pad), lambda i, k: (0, 0)),      # b1
                pl.BlockSpec((h_pad, c_pad), lambda i, k: (0, 0)),  # W2
            ],
            out_specs=pl.BlockSpec((tm, c_pad), lambda i, k: (i, 0)),
            scratch_shapes=[pltpu.VMEM((tm, c_pad), jnp.float32)],
        ),
        compiler_params=cparams,
    )(adj, xs_bf, dinv_col, w1_bf, b1_p, w2_bf)

    out_pad = pl.pallas_call(
        functools.partial(_gcn_layer2_kernel, tk, resident),
        out_shape=jax.ShapeDtypeStruct((n_pad, c_pad), jnp.float32),
        grid_spec=pltpu.PrefetchScalarGridSpec(
            num_scalar_prefetch=0,
            grid=grid,
            in_specs=[
                pl.BlockSpec((tm, tk), lambda i, k: (i, k)),        # A
                feat_spec,                                          # G
                pl.BlockSpec((tm, 1), lambda i, k: (i, 0)),         # dinv rows
                pl.BlockSpec((1, c_pad), lambda i, k: (0, 0)),      # b2
            ],
            out_specs=pl.BlockSpec((tm, c_pad), lambda i, k: (i, 0)),
            scratch_shapes=[pltpu.VMEM((tm, c_pad), jnp.float32)],
        ),
        compiler_params=cparams,
    )(adj, g, dinv_col, b2_p)

    return out_pad[:n, :c_in]


# ----------------------------------------------------------------------------
# Deterministic parameter init (xavier_uniform weights, zero bias)
# ----------------------------------------------------------------------------
def _xavier_uniform(key, fan_in, fan_out):
    bound = jnp.sqrt(6.0 / (fan_in + fan_out))
    return jax.random.uniform(key, (fan_in, fan_out), jnp.float32, -bound, bound)


def init_params(key, in_channels, hidden_channels):
    k1, k2 = jax.random.split(key)
    w1 = _xavier_uniform(k1, in_channels, hidden_channels)
    b1 = jnp.zeros((1, hidden_channels), jnp.float32)
    w2 = _xavier_uniform(k2, hidden_channels, in_channels)
    b2 = jnp.zeros((1, in_channels), jnp.float32)
    return w1, b1, w2, b2


# ----------------------------------------------------------------------------
# Pure-JAX f32 reference (same add_remaining_self_loops semantics)
# ----------------------------------------------------------------------------
def _ref_forward(x, edge_index, w1, b1, w2, b2):
    n = x.shape[0]
    src, dst = edge_index[0], edge_index[1]
    loop = jnp.arange(n, dtype=jnp.int32)
    adj = jnp.zeros((n, n), jnp.float32).at[dst, src].add(1.0)
    adj = adj.at[loop, loop].set(jnp.maximum(adj[loop, loop], 1.0))
    deg = adj.sum(axis=1)
    dinv = jnp.where(deg > 0, jax.lax.rsqrt(deg), 0.0)
    a_hat = adj * dinv[:, None] * dinv[None, :]
    h = jnp.maximum(a_hat @ (x @ w1) + b1, 0.0)
    return jnp.tanh(a_hat @ (h @ w2) + b2)


if __name__ == "__main__":
    key = jax.random.PRNGKey(0)
    k_x, k_p, k_x2, k_e1, k_e2 = jax.random.split(key, 5)

    in_channels = 4
    hidden_channels = 32
    w1, b1, w2, b2 = init_params(k_p, in_channels, hidden_channels)

    # ---- case 1: tiny bidirectional ring  -> fused single-kernel path ----
    n1 = 8
    x1 = jax.random.normal(k_x, (n1, in_channels), jnp.float32)
    s = jnp.arange(n1, dtype=jnp.int32)
    d = (s + 1) % n1
    edge_index1 = jnp.stack(
        [jnp.concatenate([s, d]), jnp.concatenate([d, s])], axis=0)

    fwd = jax.jit(trigger_generator_forward)
    out1 = jax.block_until_ready(fwd(x1, edge_index1, w1, b1, w2, b2))
    ref1 = _ref_forward(x1, edge_index1, w1, b1, w2, b2)
    assert out1.shape == (n1, in_channels)
    assert jnp.allclose(out1, ref1, atol=3e-2, rtol=3e-2)

    # ---- case 2: medium random graph -> tiled two-kernel path ----
    n2, e2 = 700, 4000
    x2 = jax.random.normal(k_x2, (n2, in_channels), jnp.float32)
    src2 = jax.random.randint(k_e1, (e2,), 0, n2, dtype=jnp.int32)
    dst2 = jax.random.randint(k_e2, (e2,), 0, n2, dtype=jnp.int32)
    edge_index2 = jnp.stack([src2, dst2], axis=0)

    fwd_tiled = jax.jit(
        functools.partial(trigger_generator_forward, force_tiled=True))
    out2 = jax.block_until_ready(fwd_tiled(x2, edge_index2, w1, b1, w2, b2))
    ref2 = _ref_forward(x2, edge_index2, w1, b1, w2, b2)
    assert out2.shape == (n2, in_channels)
    assert jnp.allclose(out2, ref2, atol=3e-2, rtol=3e-2)

    print("KERNEL_OK")
</pallas_src>

<mosaic_0001>
module attributes {stable_mosaic.version = 11 : i64} {
  func.func private @main(%arg0: i32) attributes {dimension_semantics = [#tpu.dimension_semantics<core_parallel>], iteration_bounds = array<i64: 2>, tpu.core_type = #tpu.core_type<sc_scalar_subcore>, window_params = []} {
    return
  }
}

module attributes {stable_mosaic.version = 11 : i64} {
  func.func private @main(%arg0: i32) attributes {dimension_semantics = [#tpu.dimension_semantics<core_parallel>], iteration_bounds = array<i64: 2>, tpu.core_type = #tpu.core_type<sc_scalar_subcore>, window_params = []} {
    return
  }
}

module attributes {stable_mosaic.version = 11 : i64} {
  func.func @_gcn_fused_kernel(%arg0: memref<128x128xbf16, #tpu.memory_space<vmem>>, %arg1: memref<128x128xbf16, #tpu.memory_space<vmem>>, %arg2: memref<128x1xf32, #tpu.memory_space<vmem>>, %arg3: memref<128x128xbf16, #tpu.memory_space<vmem>>, %arg4: memref<1x128xf32, #tpu.memory_space<vmem>>, %arg5: memref<128x128xbf16, #tpu.memory_space<vmem>>, %arg6: memref<1x128xf32, #tpu.memory_space<vmem>>, %arg7: memref<128x128xf32, #tpu.memory_space<vmem>>) attributes {dimension_semantics = [], scalar_prefetch = 0 : i64, scratch_operands = 0 : i64, tpu.core_type = #tpu.core_type<tc>} {
    %c0 = arith.constant 0 : index
    %c0_0 = arith.constant 0 : index
    %0 = vector.load %arg0[%c0, %c0_0] : memref<128x128xbf16, #tpu.memory_space<vmem>>, vector<128x128xbf16>
    %c0_1 = arith.constant 0 : index
    %c0_2 = arith.constant 0 : index
    %1 = vector.load %arg1[%c0_1, %c0_2] : memref<128x128xbf16, #tpu.memory_space<vmem>>, vector<128x128xbf16>
    %cst = arith.constant dense<0.000000e+00> : vector<128x128xf32>
    %2 = tpu.matmul %0, %1, %cst {dimension_numbers = #tpu.dot_dimension_numbers<[1], [0], [0], [1], [0, 0, 1, 1], [], []>} : vector<128x128xbf16>, vector<128x128xbf16>, vector<128x128xf32> -> vector<128x128xf32>
    %c0_3 = arith.constant 0 : index
    %c0_4 = arith.constant 0 : index
    %3 = vector.load %arg2[%c0_3, %c0_4] : memref<128x1xf32, #tpu.memory_space<vmem>>, vector<128x1xf32>
    %4 = vector.broadcast %3 : vector<128x1xf32> to vector<128x128xf32>
    %5 = arith.mulf %4, %2 : vector<128x128xf32>
    %6 = arith.truncf %5 : vector<128x128xf32> to vector<128x128xbf16>
    %c0_5 = arith.constant 0 : index
    %c0_6 = arith.constant 0 : index
    %7 = vector.load %arg3[%c0_5, %c0_6] : memref<128x128xbf16, #tpu.memory_space<vmem>>, vector<128x128xbf16>
    %cst_7 = arith.constant dense<0.000000e+00> : vector<128x128xf32>
    %8 = tpu.matmul %6, %7, %cst_7 {dimension_numbers = #tpu.dot_dimension_numbers<[1], [0], [0], [1], [0, 0, 1, 1], [], []>} : vector<128x128xbf16>, vector<128x128xbf16>, vector<128x128xf32> -> vector<128x128xf32>
    %c0_8 = arith.constant 0 : index
    %c0_9 = arith.constant 0 : index
    %9 = vector.load %arg4[%c0_8, %c0_9] : memref<1x128xf32, #tpu.memory_space<vmem>>, vector<1x128xf32>
    %10 = vector.broadcast %9 : vector<1x128xf32> to vector<128x128xf32>
    %11 = arith.addf %8, %10 : vector<128x128xf32>
    %cst_10 = arith.constant 0.000000e+00 : f32
    %12 = vector.broadcast %cst_10 : f32 to vector<128x128xf32>
    %13 = arith.maximumf %11, %12 : vector<128x128xf32>
    %c0_11 = arith.constant 0 : index
    %c0_12 = arith.constant 0 : index
    %14 = vector.load %arg2[%c0_11, %c0_12] : memref<128x1xf32, #tpu.memory_space<vmem>>, vector<128x1xf32>
    %15 = vector.broadcast %14 : vector<128x1xf32> to vector<128x128xf32>
    %16 = arith.mulf %15, %13 : vector<128x128xf32>
    %17 = arith.truncf %16 : vector<128x128xf32> to vector<128x128xbf16>
    %c0_13 = arith.constant 0 : index
    %c0_14 = arith.constant 0 : index
    %18 = vector.load %arg5[%c0_13, %c0_14] : memref<128x128xbf16, #tpu.memory_space<vmem>>, vector<128x128xbf16>
    %cst_15 = arith.constant dense<0.000000e+00> : vector<128x128xf32>
    %19 = tpu.matmul %17, %18, %cst_15 {dimension_numbers = #tpu.dot_dimension_numbers<[1], [0], [0], [1], [0, 0, 1, 1], [], []>} : vector<128x128xbf16>, vector<128x128xbf16>, vector<128x128xf32> -> vector<128x128xf32>
    %c0_16 = arith.constant 0 : index
    %c0_17 = arith.constant 0 : index
    %20 = vector.load %arg0[%c0_16, %c0_17] : memref<128x128xbf16, #tpu.memory_space<vmem>>, vector<128x128xbf16>
    %21 = arith.truncf %19 : vector<128x128xf32> to vector<128x128xbf16>
    %cst_18 = arith.constant dense<0.000000e+00> : vector<128x128xf32>
    %22 = tpu.matmul %20, %21, %cst_18 {dimension_numbers = #tpu.dot_dimension_numbers<[1], [0], [0], [1], [0, 0, 1, 1], [], []>} : vector<128x128xbf16>, vector<128x128xbf16>, vector<128x128xf32> -> vector<128x128xf32>
    %c0_19 = arith.constant 0 : index
    %c0_20 = arith.constant 0 : index
    %23 = vector.load %arg2[%c0_19, %c0_20] : memref<128x1xf32, #tpu.memory_space<vmem>>, vector<128x1xf32>
    %24 = vector.broadcast %23 : vector<128x1xf32> to vector<128x128xf32>
    %25 = arith.mulf %24, %22 : vector<128x128xf32>
    %c0_21 = arith.constant 0 : index
    %c0_22 = arith.constant 0 : index
    %26 = vector.load %arg6[%c0_21, %c0_22] : memref<1x128xf32, #tpu.memory_space<vmem>>, vector<1x128xf32>
    %27 = vector.broadcast %26 : vector<1x128xf32> to vector<128x128xf32>
    %28 = arith.addf %25, %27 : vector<128x128xf32>
    %29 = math.tanh %28 : vector<128x128xf32>
    %c0_23 = arith.constant 0 : index
    %c0_24 = arith.constant 0 : index
    %30 = vector.load %arg7[%c0_23, %c0_24] : memref<128x128xf32, #tpu.memory_space<vmem>>, vector<128x128xf32>
    tpu.vector_store %arg7[%c0_23, %c0_24], %29 {strides = array<i32>} : memref<128x128xf32, #tpu.memory_space<vmem>>, vector<128x128xf32>,
    return
  }
}

</mosaic_0001>

<bundles_post_ra>
// kernel: trigger_generator_forward.1
= control target key start
LH: loop header
LB: loop body
LE: loop exit
PB: predicated region body
PF: predicated region fallthrough
CT: control target
= control target key end

     0   :  { %v1214_v1 = vmov 0   ;;  %s1601_s1 = inlined_call_operand.vmem [shape: bf16[128,128], index: 1, kind: input, shape index: {}]   ;;  %s1602_s0 = inlined_call_operand.vmem [shape: bf16[128,128], index: 0, kind: input, shape index: {}]   ;;  %s1603_s2 = inlined_call_operand.vmem [shape: f32[128,1], index: 2, kind: input, shape index: {}]   ;;  %s1604_s3 = inlined_call_operand.vmem [shape: bf16[128,128], index: 3, kind: input, shape index: {}]   ;;  %s1605_s5 = inlined_call_operand.vmem [shape: bf16[128,128], index: 5, kind: input, shape index: {}]   ;;  %s1606_s4 = inlined_call_operand.vmem [shape: f32[1,128], index: 4, kind: input, shape index: {}]   ;;  %s1607_s6 = inlined_call_operand.vmem [shape: f32[1,128], index: 6, kind: input, shape index: {}]   ;;  %s1608_s7 = inlined_call_operand.vmem [shape: f32[128,128], index: 7, kind: output, shape index: {}]  }
   0x1   :  { %v1150_v0 = vld [vmem:[%s1601_s1] sm:$0xff]   ;;  %1148 = vset.pattern.permute.xlu0 %v1214_v1  ;;  %1149 = vset.pattern.permute.xlu1 %v1214_v1  ;;  %v1151_v2 = vld [vmem:[%s1601_s1 + $0x8] sm:$0xff]   ;;  %v1152_v3 = vld [vmem:[%s1601_s1 + $0x10] sm:$0xff]  }
   0x2   :  { %1019 = vmatprep.subr.bf16.mxu0 %v1150_v0  ;;  %v1153_v4 = vld [vmem:[%s1601_s1 + $0x18] sm:$0xff]   ;;  %v1270_v5 = vld [vmem:[%s1602_s0] sm:$0xff]   ;;  %v1155_v7 = vld [vmem:[%s1601_s1 + $0x28] sm:$0xff]  }
   0x3   :  { %1020 = vmatpush3.bf16.msra.mxu0 %v1150_v0  ;;  %1035 = vmatprep.mubr.bf16.mxu0 %v1270_v5  ;;  %v1154_v6 = vld [vmem:[%s1601_s1 + $0x20] sm:$0xff]   ;;  %v254_v9 = vld [vmem:[%s1603_s2 + $0x10] sm:$0xff]  ;;  %v253_v10 = vld [vmem:[%s1603_s2 + $0x8] sm:$0xff] }
   0x4   :  { %1021 = vmatprep.subr.bf16.mxu0 %v1151_v2  ;;  %v252_v8 = vld [vmem:[%s1603_s2] sm:$0xff]  ;;  %280 = vperm.xlu1 %1149, %v254_v9   ;;  %v255_v11 = vld [vmem:[%s1603_s2 + $0x18] sm:$0xff]  ;;  %v1156_v12 = vld [vmem:[%s1601_s1 + $0x30] sm:$0xff]  }
   0x5   :  { %270 = vperm.xlu0 %1148, %v252_v8   ;;  %v256_v13 = vld [vmem:[%s1603_s2 + $0x20] sm:$0xff]  ;;  %v257_v14 = vld [vmem:[%s1603_s2 + $0x28] sm:$0xff]  ;;  %v1157_v15 = vld [vmem:[%s1601_s1 + $0x38] sm:$0xff]  }
   0x6   :  { %v1166_v16 = vld [vmem:[%s1604_s3] sm:$0xff]   ;;  %v258_v17 = vld [vmem:[%s1603_s2 + $0x30] sm:$0xff]  ;;  %v259_v18 = vld [vmem:[%s1603_s2 + $0x38] sm:$0xff] }
   0x7   :  { %1022 = vmatpush3.bf16.msra.mxu0 %v1151_v2  ;;  %1051 = vmatprep.subr.bf16.mxu1 %v1166_v16  ;;  %v1167_v19 = vld [vmem:[%s1604_s3 + $0x8] sm:$0xff]   ;;  %v1168_v20 = vld [vmem:[%s1604_s3 + $0x10] sm:$0xff]   ;;  %v260_v22 = vld [vmem:[%s1603_s2 + $0x40] sm:$0xff] }
   0x8   :  { %1023 = vmatprep.subr.bf16.mxu0 %v1152_v3  ;;  %285 = vperm.xlu1 %1149, %v255_v11   ;;  %v1321_v21 = vld [vmem:[%s1602_s0 + $0x8] sm:$0xff]   ;;  %v1332_v24 = vld [vmem:[%s1602_s0 + $0x10] sm:$0xff]   ;;  %v1169_v25 = vld [vmem:[%s1604_s3 + $0x18] sm:$0xff]  }
   0x9   :  { %275 = vperm.xlu0 %1148, %v253_v10   ;;  %1052 = vmatpush3.bf16.msra.mxu1 %v1166_v16  ;;  %v261_v23 = vld [vmem:[%s1603_s2 + $0x48] sm:$0xff]  ;;  %v262_v26 = vld [vmem:[%s1603_s2 + $0x50] sm:$0xff]  ;;  %v263_v27 = vld [vmem:[%s1603_s2 + $0x58] sm:$0xff] }
   0xa   :  { %1053 = vmatprep.subr.bf16.mxu1 %v1167_v19  ;;  %v1170_v28 = vld [vmem:[%s1604_s3 + $0x20] sm:$0xff]   ;;  %v1351_v29 = vld [vmem:[%s1602_s0 + $0x18] sm:$0xff]   ;;  %v265_v31 = vld [vmem:[%s1603_s2 + $0x68] sm:$0xff] }
   0xb   :  { %1024 = vmatpush3.bf16.msra.mxu0 %v1152_v3  ;;  %v264_v30 = vld [vmem:[%s1603_s2 + $0x60] sm:$0xff]  ;;  %v1171_v33 = vld [vmem:[%s1604_s3 + $0x28] sm:$0xff]   ;;  %v266_v34 = vld [vmem:[%s1603_s2 + $0x70] sm:$0xff] }
   0xc   :  { %1025 = vmatprep.subr.bf16.mxu0 %v1153_v4  ;;  %295 = vperm.xlu1 %1149, %v257_v14   ;;  %v1362_v32 = vld [vmem:[%s1602_s0 + $0x20] sm:$0xff]   ;;  %v267_v35 = vld [vmem:[%s1603_s2 + $0x78] sm:$0xff]  ;;  %v1378_v36 = vld [vmem:[%s1602_s0 + $0x28] sm:$0xff]  }
   0xd   :  { %290 = vperm.xlu0 %1148, %v256_v13   ;;  %1054 = vmatpush3.bf16.msra.mxu1 %v1167_v19  ;;  %v1383_v37 = vld [vmem:[%s1602_s0 + $0x30] sm:$0xff]   ;;  %v1390_v38 = vld [vmem:[%s1602_s0 + $0x38] sm:$0xff]   ;;  %v1174_v41 = vld [vmem:[%s1605_s5] sm:$0xff]  }
   0xe   :  { %1055 = vmatprep.subr.bf16.mxu1 %v1168_v20  ;;  %v1172_v39 = vld [vmem:[%s1604_s3 + $0x30] sm:$0xff]   ;;  %v1173_v40 = vld [vmem:[%s1604_s3 + $0x38] sm:$0xff]   ;;  %v1175_v42 = vld [vmem:[%s1605_s5 + $0x8] sm:$0xff]  }
   0xf   :  { %1026 = vmatpush3.bf16.msra.mxu0 %v1153_v4  ;;  %v1176_v43 = vld [vmem:[%s1605_s5 + $0x10] sm:$0xff]   ;;  %v1177_v44 = vld [vmem:[%s1605_s5 + $0x18] sm:$0xff]   ;;  %v1178_v45 = vld [vmem:[%s1605_s5 + $0x20] sm:$0xff]  }
  0x10   :  { %1027 = vmatprep.subr.bf16.mxu0 %v1154_v6  ;;  %305 = vperm.xlu1 %1149, %v259_v18  }
  0x11   :  { %300 = vperm.xlu0 %1148, %v258_v17   ;;  %1056 = vmatpush3.bf16.msra.mxu1 %v1168_v20 }
  0x12   :  { %1057 = vmatprep.subr.bf16.mxu1 %v1169_v25 }
  0x13   :  { %1028 = vmatpush3.bf16.msra.mxu0 %v1154_v6 }
  0x14   :  { %1029 = vmatprep.subr.bf16.mxu0 %v1155_v7  ;;  %315 = vperm.xlu1 %1149, %v261_v23  }
  0x15   :  { %310 = vperm.xlu0 %1148, %v260_v22   ;;  %1058 = vmatpush3.bf16.msra.mxu1 %v1169_v25 }
  0x16   :  { %1059 = vmatprep.subr.bf16.mxu1 %v1170_v28 }
  0x17   :  { %1030 = vmatpush3.bf16.msra.mxu0 %v1155_v7 }
  0x18   :  { %1031 = vmatprep.subr.bf16.mxu0 %v1156_v12  ;;  %325 = vperm.xlu1 %1149, %v263_v27  }
  0x19   :  { %320 = vperm.xlu0 %1148, %v262_v26   ;;  %1060 = vmatpush3.bf16.msra.mxu1 %v1170_v28 }
  0x1a   :  { %1061 = vmatprep.subr.bf16.mxu1 %v1171_v33 }
  0x1b   :  { %1032 = vmatpush3.bf16.msra.mxu0 %v1156_v12 }
  0x1c   :  { %1033 = vmatprep.subr.bf16.mxu0 %v1157_v15  ;;  %335 = vperm.xlu1 %1149, %v265_v31  }
  0x1d   :  { %330 = vperm.xlu0 %1148, %v264_v30   ;;  %1062 = vmatpush3.bf16.msra.mxu1 %v1171_v33 }
  0x1e   :  { %1063 = vmatprep.subr.bf16.mxu1 %v1172_v39 }
  0x1f   :  { %1034 = vmatpush3.bf16.msra.mxu0 %v1157_v15 }
  0x20   :  { %345 = vperm.xlu1 %1149, %v267_v35   ;;  %1083 = vmatprep.subr.bf16.mxu0 %v1174_v41 }
  0x21   :  { %340 = vperm.xlu0 %1148, %v266_v34   ;;  %1064 = vmatpush3.bf16.msra.mxu1 %v1172_v39 }
  0x22   :  { %1036 = vmatmul.mubr.bf16.vlgmr.msra.gmra.mrb[0].mxu0 %v1321_v21  ;;  %1065 = vmatprep.subr.bf16.mxu1 %v1173_v40 }
  0x23   :  { %1039 = vmatprep.mubr.bf16.mxu0 %v1332_v24  ;;  %1084 = vmatpush3.bf16.msra.mxu0 %v1174_v41 }
  0x24   :  { %1085 = vmatprep.subr.bf16.mxu0 %v1175_v42 }
  0x25   :  { %1066 = vmatpush3.bf16.msra.mxu1 %v1173_v40 }
  0x27   :  { %1086 = vmatpush3.bf16.msra.mxu0 %v1175_v42 }
  0x28   :  { %1087 = vmatprep.subr.bf16.mxu0 %v1176_v43 }
  0x2a   :  { %1040 = vmatmul.mubr.bf16.gmra.mrb[4].mxu0 %v1351_v29 }
  0x2b   :  { %1043 = vmatprep.mubr.bf16.mxu0 %v1362_v32  ;;  %1088 = vmatpush3.bf16.msra.mxu0 %v1176_v43 }
  0x2c   :  { %1089 = vmatprep.subr.bf16.mxu0 %v1177_v44 }
  0x2f   :  { %1090 = vmatpush3.bf16.msra.mxu0 %v1177_v44 }
  0x30   :  { %1091 = vmatprep.subr.bf16.mxu0 %v1178_v45 }
  0x32   :  { %1044 = vmatmul.mubr.bf16.gmra.mrb[8].mxu0 %v1378_v36 }
  0x33   :  { %1047 = vmatprep.mubr.bf16.mxu0 %v1383_v37  ;;  %1092 = vmatpush3.bf16.msra.mxu0 %v1178_v45 }
  0x3a   :  { %1048 = vmatmul.mubr.bf16.gmra.mrb[12].mxu0 %v1390_v38 }
  0x83   :  { %v1416_v47 = vpop.permute.xlu1 %280 }
  0x84   :  { %v1414_v46 = vpop.permute.xlu0 %270 }
  0x87   :  { %v1420_v49 = vpop.permute.xlu1 %285 }
  0x88   :  { %v1418_v48 = vpop.permute.xlu0 %275 }
  0x8b   :  { %v1424_v51 = vpop.permute.xlu1 %295 }
  0x8c   :  { %v1422_v50 = vpop.permute.xlu0 %290 }
  0x8f   :  { %v1428_v55 = vpop.permute.xlu1 %305 }
  0x90   :  { %v1426_v53 = vpop.permute.xlu0 %300 }
  0x93   :  { %v1436_v1 = vpop.permute.xlu1 %315 }
  0x94   :  { %v1434_v0 = vpop.permute.xlu0 %310 }
  0x97   :  { %v1444_v13 = vpop.permute.xlu1 %325 }
  0x98   :  { %v1442_v11 = vpop.permute.xlu0 %320 }
  0x9b   :  { %v1450_v23 = vpop.permute.xlu1 %335 }
  0x9c   :  { %v1446_v18 = vpop.permute.xlu0 %330 }
  0x9f   :  { %v1456_v34 = vpop.permute.xlu1 %345 }
  0xa0   :  { %v1454_v31 = vpop.permute.xlu0 %340 }
  0xf5   :  { %v1037_v52 = vpop.f32.mrb[0].mxu0 }
  0xf6   :  { %v189_v54 = vpop.f32.mrb[1].mxu0  ;;  %v350_v57 = vmul.f32 %v1037_v52, %v1416_v47  ;;  %v1179_v52 = vld [vmem:[%s1605_s5 + $0x28] sm:$0xff]  }
  0xf7   :  { %v1038_v56 = vpop.f32.mrb[2].mxu0  ;;  %v348_v60 = vmul.f32 %v1414_v46, %v189_v54  ;;  %1093 = vmatprep.subr.bf16.mxu0 %v1179_v52  ;;  %v1180_v54 = vld [vmem:[%s1605_s5 + $0x30] sm:$0xff]  }
  0xf8   :  { %v351_v58 = vmul.f32 %v1038_v56, %v1420_v49  ;;  %v192_v59 = vpop.f32.mrb[3].mxu0  ;;  %1094 = vmatpush3.bf16.msra.mxu0 %v1179_v52  ;;  %v1181_v56 = vld [vmem:[%s1605_s5 + $0x38] sm:$0xff]  }
  0xf9   :  { %v349_v61 = vmul.f32 %v1418_v48, %v192_v59  ;;  %1095 = vmatprep.subr.bf16.mxu0 %v1180_v54 }
  0xfa   :  { %v365_v62 = vpack.c.bf16 %v351_v58, %v350_v57 }
  0xfb   :  { %v364_v63 = vpack.c.bf16 %v349_v61, %v348_v60 }
  0xfc   :  { %1096 = vmatpush3.bf16.msra.mxu0 %v1180_v54 }
  0xfd   :  { %v1041_v2 = vpop.f32.mrb[4].mxu0  ;;  %1067 = vmatprep.mubr.bf16.mxu1 %v364_v63  ;;  %1097 = vmatprep.subr.bf16.mxu0 %v1181_v56 }
  0xfe   :  { %v205_v3 = vpop.f32.mrb[5].mxu0  ;;  %1068 = vmatmul.mubr.bf16.vlgmr.msra.gmra.mrb[0].mxu1 %v365_v62  ;;  %v354_v6 = vmul.f32 %v1041_v2, %v1426_v53 }
  0xff   :  { %v1042_v4 = vpop.f32.mrb[6].mxu0  ;;  %v352_v9 = vmul.f32 %v1422_v50, %v205_v3 }
 0x100   :  { %v355_v7 = vmul.f32 %v1042_v4, %v1428_v55  ;;  %v208_v8 = vpop.f32.mrb[7].mxu0  ;;  %1098 = vmatpush3.bf16.msra.mxu0 %v1181_v56 }
 0x101   :  { %v353_v10 = vmul.f32 %v1424_v51, %v208_v8 }
 0x102   :  { %v367_v12 = vpack.c.bf16 %v355_v7, %v354_v6 }
 0x103   :  { %v366_v14 = vpack.c.bf16 %v353_v10, %v352_v9 }
 0x105   :  { %v1045_v15 = vpop.f32.mrb[8].mxu0  ;;  %1071 = vmatprep.mubr.bf16.mxu1 %v366_v14 }
 0x106   :  { %v221_v16 = vpop.f32.mrb[9].mxu0  ;;  %1072 = vmatmul.mubr.bf16.gmra.mrb[4].mxu1 %v367_v12  ;;  %v358_v19 = vmul.f32 %v1045_v15, %v1442_v11 }
 0x107   :  { %v1046_v17 = vpop.f32.mrb[10].mxu0  ;;  %v356_v25 = vmul.f32 %v1434_v0, %v221_v16 }
 0x108   :  { %v359_v20 = vmul.f32 %v1046_v17, %v1444_v13  ;;  %v224_v22 = vpop.f32.mrb[11].mxu0 }
 0x109   :  { %v357_v26 = vmul.f32 %v1436_v1, %v224_v22 }
 0x10a   :  { %v369_v27 = vpack.c.bf16 %v359_v20, %v358_v19 }
 0x10b   :  { %v368_v28 = vpack.c.bf16 %v357_v26, %v356_v25 }
 0x10d   :  { %v1049_v30 = vpop.f32.mrb[12].mxu0  ;;  %1075 = vmatprep.mubr.bf16.mxu1 %v368_v28 }
 0x10e   :  { %v237_v33 = vpop.f32.mrb[13].mxu0  ;;  %1076 = vmatmul.mubr.bf16.gmra.mrb[8].mxu1 %v369_v27  ;;  %v362_v39 = vmul.f32 %v1049_v30, %v1454_v31 }
 0x10f   :  { %v1050_v35 = vpop.f32.mrb[14].mxu0  ;;  %v360_v42 = vmul.f32 %v1446_v18, %v237_v33 }
 0x110   :  { %v363_v40 = vmul.f32 %v1050_v35, %v1456_v34  ;;  %v240_v41 = vpop.f32.mrb[15].mxu0 }
 0x111   :  { %v361_v43 = vmul.f32 %v1450_v23, %v240_v41 }
 0x112   :  { %v371_v44 = vpack.c.bf16 %v363_v40, %v362_v39 }
 0x113   :  { %v370_v45 = vpack.c.bf16 %v361_v43, %v360_v42 }
 0x115   :  { %1079 = vmatprep.mubr.bf16.mxu1 %v370_v45 }
 0x116   :  { %1080 = vmatmul.mubr.bf16.gmra.mrb[12].mxu1 %v371_v44 }
 0x117   :  { %1131 = vmatprep.mubr.bf16.mxu1 %v1270_v5  ;;  %v1475_v5 = vld [vmem:[%s1606_s4] ss:$0 sm:$0xff] }
 0x1d1   :  { %v1069_v57 = vpop.f32.mrb[0].mxu1 }
 0x1d2   :  { %v486_v58 = vadd.f32 %v1069_v57, %v1475_v5  ;;  %v477_v59 = vpop.f32.mrb[1].mxu1 }
 0x1d3   :  { %v478_v60 = vadd.f32 %v1475_v5, %v477_v59  ;;  %v1070_v61 = vpop.f32.mrb[2].mxu1 }
 0x1d4   :  { %v542_v62 = vmax.f32 %v486_v58, 0.0  ;;  %v489_v63 = vadd.f32 %v1070_v61, %v1475_v5  ;;  %v480_v2 = vpop.f32.mrb[3].mxu1 }
 0x1d5   :  { %v540_v3 = vmax.f32 %v478_v60, 0.0  ;;  %v481_v4 = vadd.f32 %v1475_v5, %v480_v2 }
 0x1d6   :  { %v543_v6 = vmax.f32 %v489_v63, 0.0  ;;  %v558_v8 = vmul.f32 %v542_v62, %v1416_v47 }
 0x1d7   :  { %v541_v7 = vmax.f32 %v481_v4, 0.0  ;;  %v556_v10 = vmul.f32 %v540_v3, %v1414_v46 }
 0x1d8   :  { %v559_v9 = vmul.f32 %v543_v6, %v1420_v49 }
 0x1d9   :  { %v557_v12 = vmul.f32 %v541_v7, %v1418_v48  ;;  %v1073_v14 = vpop.f32.mrb[4].mxu1 }
 0x1da   :  { %v573_v15 = vpack.c.bf16 %v559_v9, %v558_v8  ;;  %v502_v16 = vadd.f32 %v1073_v14, %v1475_v5  ;;  %v493_v17 = vpop.f32.mrb[5].mxu1 }
 0x1db   :  { %v494_v19 = vadd.f32 %v1475_v5, %v493_v17  ;;  %v1074_v20 = vpop.f32.mrb[6].mxu1  ;;  %v572_v22 = vpack.c.bf16 %v557_v12, %v556_v10 }
 0x1dc   :  { %v546_v25 = vmax.f32 %v502_v16, 0.0  ;;  %v505_v26 = vadd.f32 %v1074_v20, %v1475_v5  ;;  %v496_v27 = vpop.f32.mrb[7].mxu1 }
 0x1dd   :  { %v544_v28 = vmax.f32 %v494_v19, 0.0  ;;  %v497_v30 = vadd.f32 %v1475_v5, %v496_v27  ;;  %1099 = vmatprep.mubr.bf16.mxu0 %v572_v22 }
 0x1de   :  { %v547_v33 = vmax.f32 %v505_v26, 0.0  ;;  %1100 = vmatmul.mubr.bf16.vlgmr.msra.gmra.mrb[16].mxu0 %v573_v15  ;;  %v562_v39 = vmul.f32 %v546_v25, %v1426_v53 }
 0x1df   :  { %v545_v35 = vmax.f32 %v497_v30, 0.0  ;;  %v560_v41 = vmul.f32 %v544_v28, %v1422_v50 }
 0x1e0   :  { %v563_v40 = vmul.f32 %v547_v33, %v1428_v55 }
 0x1e1   :  { %v561_v42 = vmul.f32 %v545_v35, %v1424_v51  ;;  %v1077_v43 = vpop.f32.mrb[8].mxu1 }
 0x1e2   :  { %v518_v44 = vadd.f32 %v1077_v43, %v1475_v5  ;;  %v509_v45 = vpop.f32.mrb[9].mxu1  ;;  %v575_v52 = vpack.c.bf16 %v563_v40, %v562_v39 }
 0x1e3   :  { %v510_v54 = vadd.f32 %v1475_v5, %v509_v45  ;;  %v1078_v56 = vpop.f32.mrb[10].mxu1  ;;  %v574_v57 = vpack.c.bf16 %v561_v42, %v560_v41 }
 0x1e4   :  { %v550_v58 = vmax.f32 %v518_v44, 0.0  ;;  %v521_v59 = vadd.f32 %v1078_v56, %v1475_v5  ;;  %v512_v60 = vpop.f32.mrb[11].mxu1 }
 0x1e5   :  { %v548_v61 = vmax.f32 %v510_v54, 0.0  ;;  %v513_v62 = vadd.f32 %v1475_v5, %v512_v60  ;;  %1103 = vmatprep.mubr.bf16.mxu0 %v574_v57 }
 0x1e6   :  { %v551_v63 = vmax.f32 %v521_v59, 0.0  ;;  %1104 = vmatmul.mubr.bf16.gmra.mrb[20].mxu0 %v575_v52  ;;  %v566_v3 = vmul.f32 %v550_v58, %v1442_v11 }
 0x1e7   :  { %v549_v2 = vmax.f32 %v513_v62, 0.0  ;;  %v564_v6 = vmul.f32 %v548_v61, %v1434_v0 }
 0x1e8   :  { %v567_v4 = vmul.f32 %v551_v63, %v1444_v13 }
 0x1e9   :  { %v565_v7 = vmul.f32 %v549_v2, %v1436_v1  ;;  %v1081_v8 = vpop.f32.mrb[12].mxu1 }
 0x1ea   :  { %v534_v9 = vadd.f32 %v1081_v8, %v1475_v5  ;;  %v525_v10 = vpop.f32.mrb[13].mxu1  ;;  %v577_v12 = vpack.c.bf16 %v567_v4, %v566_v3 }
 0x1eb   :  { %v526_v14 = vadd.f32 %v1475_v5, %v525_v10  ;;  %v1082_v15 = vpop.f32.mrb[14].mxu1  ;;  %v576_v16 = vpack.c.bf16 %v565_v7, %v564_v6 }
 0x1ec   :  { %v554_v17 = vmax.f32 %v534_v9, 0.0  ;;  %v537_v19 = vadd.f32 %v1082_v15, %v1475_v5  ;;  %v528_v20 = vpop.f32.mrb[15].mxu1 }
 0x1ed   :  { %v552_v22 = vmax.f32 %v526_v14, 0.0  ;;  %v529_v25 = vadd.f32 %v1475_v5, %v528_v20  ;;  %1107 = vmatprep.mubr.bf16.mxu0 %v576_v16  ;;  %v1519_v14 = vld [vmem:[%s1607_s6] ss:$0 sm:$0xff] }
 0x1ee   :  { %v555_v26 = vmax.f32 %v537_v19, 0.0  ;;  %1108 = vmatmul.mubr.bf16.gmra.mrb[24].mxu0 %v577_v12  ;;  %v570_v28 = vmul.f32 %v554_v17, %v1454_v31 }
 0x1ef   :  { %v553_v27 = vmax.f32 %v529_v25, 0.0  ;;  %v568_v33 = vmul.f32 %v552_v22, %v1446_v18 }
 0x1f0   :  { %v571_v30 = vmul.f32 %v555_v26, %v1456_v34 }
 0x1f1   :  { %v569_v35 = vmul.f32 %v553_v27, %v1450_v23 }
 0x1f2   :  { %v579_v39 = vpack.c.bf16 %v571_v30, %v570_v28 }
 0x1f3   :  { %v578_v40 = vpack.c.bf16 %v569_v35, %v568_v33 }
 0x1f5   :  { %1111 = vmatprep.mubr.bf16.mxu0 %v578_v40 }
 0x1f6   :  { %1112 = vmatmul.mubr.bf16.gmra.mrb[28].mxu0 %v579_v39 }
 0x2b1   :  { %v1101_v41 = vpop.f32.mrb[16].mxu0 }
 0x2b2   :  { %v678_v42 = vpop.f32.mrb[17].mxu0 }
 0x2b3   :  { %v1102_v43 = vpop.f32.mrb[18].mxu0 }
 0x2b4   :  { %v742_v5 = vpack.c.bf16 %v1102_v43, %v1101_v41  ;;  %v681_v44 = vpop.f32.mrb[19].mxu0 }
 0x2b5   :  { %v741_v45 = vpack.c.bf16 %v681_v44, %v678_v42 }
 0x2b7   :  { %1115 = vmatprep.subr.bf16.mxu1 %v741_v45 }
 0x2b8   :  { %1116 = vmatpush3.bf16.msra.mxu1 %v741_v45 }
 0x2b9   :  { %v1105_v52 = vpop.f32.mrb[20].mxu0  ;;  %1117 = vmatprep.subr.bf16.mxu1 %v742_v5 }
 0x2ba   :  { %v694_v54 = vpop.f32.mrb[21].mxu0 }
 0x2bb   :  { %v1106_v56 = vpop.f32.mrb[22].mxu0 }
 0x2bc   :  { %v744_v57 = vpack.c.bf16 %v1106_v56, %v1105_v52  ;;  %v697_v58 = vpop.f32.mrb[23].mxu0  ;;  %1118 = vmatpush3.bf16.msra.mxu1 %v742_v5 }
 0x2bd   :  { %v743_v59 = vpack.c.bf16 %v697_v58, %v694_v54 }
 0x2bf   :  { %1119 = vmatprep.subr.bf16.mxu1 %v743_v59 }
 0x2c0   :  { %1120 = vmatpush3.bf16.msra.mxu1 %v743_v59 }
 0x2c1   :  { %v1109_v60 = vpop.f32.mrb[24].mxu0  ;;  %1121 = vmatprep.subr.bf16.mxu1 %v744_v57 }
 0x2c2   :  { %v710_v61 = vpop.f32.mrb[25].mxu0 }
 0x2c3   :  { %v1110_v62 = vpop.f32.mrb[26].mxu0 }
 0x2c4   :  { %v746_v63 = vpack.c.bf16 %v1110_v62, %v1109_v60  ;;  %v713_v2 = vpop.f32.mrb[27].mxu0  ;;  %1122 = vmatpush3.bf16.msra.mxu1 %v744_v57 }
 0x2c5   :  { %v745_v3 = vpack.c.bf16 %v713_v2, %v710_v61 }
 0x2c7   :  { %1123 = vmatprep.subr.bf16.mxu1 %v745_v3 }
 0x2c8   :  { %1124 = vmatpush3.bf16.msra.mxu1 %v745_v3 }
 0x2c9   :  { %v1113_v4 = vpop.f32.mrb[28].mxu0  ;;  %1125 = vmatprep.subr.bf16.mxu1 %v746_v63 }
 0x2ca   :  { %v726_v6 = vpop.f32.mrb[29].mxu0 }
 0x2cb   :  { %v1114_v7 = vpop.f32.mrb[30].mxu0 }
 0x2cc   :  { %v748_v8 = vpack.c.bf16 %v1114_v7, %v1113_v4  ;;  %v729_v9 = vpop.f32.mrb[31].mxu0  ;;  %1126 = vmatpush3.bf16.msra.mxu1 %v746_v63 }
 0x2cd   :  { %v747_v10 = vpack.c.bf16 %v729_v9, %v726_v6 }
 0x2cf   :  { %1127 = vmatprep.subr.bf16.mxu1 %v747_v10 }
 0x2d0   :  { %1128 = vmatpush3.bf16.msra.mxu1 %v747_v10 }
 0x2d1   :  { %1129 = vmatprep.subr.bf16.mxu1 %v748_v8 }
 0x2d4   :  { %1130 = vmatpush3.bf16.msra.mxu1 %v748_v8 }
 0x2d7   :  { %1132 = vmatmul.mubr.bf16.vlgmr.msra.gmra.mrb[16].mxu1 %v1321_v21 }
 0x2d8   :  { %1135 = vmatprep.mubr.bf16.mxu1 %v1332_v24 }
 0x2df   :  { %1136 = vmatmul.mubr.bf16.gmra.mrb[20].mxu1 %v1351_v29 }
 0x2e0   :  { %1139 = vmatprep.mubr.bf16.mxu1 %v1362_v32 }
 0x2e7   :  { %1140 = vmatmul.mubr.bf16.gmra.mrb[24].mxu1 %v1378_v36 }
 0x2e8   :  { %1143 = vmatprep.mubr.bf16.mxu1 %v1383_v37 }
 0x2ef   :  { %1144 = vmatmul.mubr.bf16.gmra.mrb[28].mxu1 %v1390_v38 }
 0x3aa   :  { %v1133_v12 = vpop.f32.mrb[16].mxu1 }
 0x3ab   :  { %v848_v21 = vmul.f32 %v1133_v12, %v1416_v47  ;;  %v783_v15 = vpop.f32.mrb[17].mxu1 }
 0x3ac   :  { %v846_v24 = vmul.f32 %v783_v15, %v1414_v46  ;;  %v1134_v29 = vpop.f32.mrb[18].mxu1 }
 0x3ad   :  { %v871_v32 = vadd.f32 %v1519_v14, %v848_v21  ;;  %v849_v36 = vmul.f32 %v1134_v29, %v1420_v49  ;;  %v786_v16 = vpop.f32.mrb[19].mxu1 }
 0x3ae   :  { %v869_v37 = vadd.f32 %v1519_v14, %v846_v24  ;;  %v847_v38 = vmul.f32 %v786_v16, %v1418_v48 }
 0x3af   :  { %1182 = vtanh.f32 %v871_v32  ;;  %v872_v17 = vadd.f32 %v1519_v14, %v849_v36 }
 0x3b0   :  { %1184 = vtanh.f32 %v869_v37  ;;  %v870_v19 = vadd.f32 %v1519_v14, %v847_v38 }
 0x3b1   :  { %1186 = vtanh.f32 %v872_v17 }
 0x3b2   :  { %1188 = vtanh.f32 %v870_v19  ;;  %v1137_v47 = vpop.f32.mrb[20].mxu1 }
 0x3b3   :  { %v852_v46 = vmul.f32 %v1137_v47, %v1426_v53  ;;  %v799_v20 = vpop.f32.mrb[21].mxu1 }
 0x3b4   :  { %v850_v22 = vmul.f32 %v799_v20, %v1422_v50  ;;  %v1138_v49 = vpop.f32.mrb[22].mxu1 }
 0x3b5   :  { %v875_v25 = vadd.f32 %v1519_v14, %v852_v46  ;;  %v853_v26 = vmul.f32 %v1138_v49, %v1428_v55  ;;  %v802_v48 = vpop.f32.mrb[23].mxu1 }
 0x3b6   :  { %v873_v27 = vadd.f32 %v1519_v14, %v850_v22  ;;  %v851_v28 = vmul.f32 %v802_v48, %v1424_v51 }
 0x3b7   :  { %1190 = vtanh.f32 %v875_v25  ;;  %v876_v30 = vadd.f32 %v1519_v14, %v853_v26 }
 0x3b8   :  { %1192 = vtanh.f32 %v873_v27  ;;  %v874_v33 = vadd.f32 %v1519_v14, %v851_v28 }
 0x3b9   :  { %v1183_v53 = vpop.eup %1182  ;;  %1194 = vtanh.f32 %v876_v30 }
 0x3ba   :  { %v1185_v35 = vpop.eup %1184  ;;  %903 = vst [vmem:[%s1608_s7 + $0x10] sm:$0xff] %v1183_v53  ;;  %1196 = vtanh.f32 %v874_v33  ;;  %v1141_v50 = vpop.f32.mrb[24].mxu1 }
 0x3bb   :  { %v1187_v55 = vpop.eup %1186  ;;  %901 = vst [vmem:[%s1608_s7] sm:$0xff] %v1185_v35  ;;  %v856_v51 = vmul.f32 %v1141_v50, %v1442_v11  ;;  %v815_v39 = vpop.f32.mrb[25].mxu1 }
 0x3bc   :  { %v1189_v40 = vpop.eup %1188  ;;  %904 = vst [vmem:[%s1608_s7 + $0x18] sm:$0xff] %v1187_v55  ;;  %v854_v41 = vmul.f32 %v815_v39, %v1434_v0  ;;  %v1142_v42 = vpop.f32.mrb[26].mxu1 }
 0x3bd   :  { %902 = vst [vmem:[%s1608_s7 + $0x8] sm:$0xff] %v1189_v40  ;;  %v879_v43 = vadd.f32 %v1519_v14, %v856_v51  ;;  %v857_v5 = vmul.f32 %v1142_v42, %v1444_v13  ;;  %v818_v44 = vpop.f32.mrb[27].mxu1 }
 0x3be   :  { %v877_v11 = vadd.f32 %v1519_v14, %v854_v41  ;;  %v855_v45 = vmul.f32 %v818_v44, %v1436_v1 }
 0x3bf   :  { %1198 = vtanh.f32 %v879_v43  ;;  %v880_v52 = vadd.f32 %v1519_v14, %v857_v5 }
 0x3c0   :  { %1200 = vtanh.f32 %v877_v11  ;;  %v878_v0 = vadd.f32 %v1519_v14, %v855_v45 }
 0x3c1   :  { %v1191_v54 = vpop.eup %1190  ;;  %1202 = vtanh.f32 %v880_v52 }
 0x3c2   :  { %v1193_v56 = vpop.eup %1192  ;;  %907 = vst [vmem:[%s1608_s7 + $0x30] sm:$0xff] %v1191_v54  ;;  %1204 = vtanh.f32 %v878_v0  ;;  %v1145_v13 = vpop.f32.mrb[28].mxu1 }
 0x3c3   :  { %v1195_v57 = vpop.eup %1194  ;;  %905 = vst [vmem:[%s1608_s7 + $0x20] sm:$0xff] %v1193_v56  ;;  %v860_v1 = vmul.f32 %v1145_v13, %v1454_v31  ;;  %v831_v58 = vpop.f32.mrb[29].mxu1 }
 0x3c4   :  { %v1197_v59 = vpop.eup %1196  ;;  %908 = vst [vmem:[%s1608_s7 + $0x38] sm:$0xff] %v1195_v57  ;;  %v858_v60 = vmul.f32 %v831_v58, %v1446_v18  ;;  %v1146_v61 = vpop.f32.mrb[30].mxu1 }
 0x3c5   :  { %906 = vst [vmem:[%s1608_s7 + $0x28] sm:$0xff] %v1197_v59  ;;  %v883_v62 = vadd.f32 %v1519_v14, %v860_v1  ;;  %v861_v63 = vmul.f32 %v1146_v61, %v1456_v34  ;;  %v834_v2 = vpop.f32.mrb[31].mxu1 }
 0x3c6   :  { %v881_v31 = vadd.f32 %v1519_v14, %v858_v60  ;;  %v859_v3 = vmul.f32 %v834_v2, %v1450_v23 }
 0x3c7   :  { %1206 = vtanh.f32 %v883_v62  ;;  %v884_v4 = vadd.f32 %v1519_v14, %v861_v63 }
 0x3c8   :  { %1208 = vtanh.f32 %v881_v31  ;;  %v882_v18 = vadd.f32 %v1519_v14, %v859_v3 }
 0x3c9   :  { %v1199_v6 = vpop.eup %1198  ;;  %1210 = vtanh.f32 %v884_v4 }
 0x3ca   :  { %v1201_v7 = vpop.eup %1200  ;;  %911 = vst [vmem:[%s1608_s7 + $0x50] sm:$0xff] %v1199_v6  ;;  %1212 = vtanh.f32 %v882_v18 }
 0x3cb   :  { %v1203_v34 = vpop.eup %1202  ;;  %909 = vst [vmem:[%s1608_s7 + $0x40] sm:$0xff] %v1201_v7 }
 0x3cc   :  { %v1205_v23 = vpop.eup %1204  ;;  %912 = vst [vmem:[%s1608_s7 + $0x58] sm:$0xff] %v1203_v34 }
 0x3cd   :  { %910 = vst [vmem:[%s1608_s7 + $0x48] sm:$0xff] %v1205_v23 }
 0x3d1   :  { %v1207_v8 = vpop.eup %1206 }
 0x3d2   :  { %v1209_v9 = vpop.eup %1208  ;;  %915 = vst [vmem:[%s1608_s7 + $0x70] sm:$0xff] %v1207_v8 }
 0x3d3   :  { %v1211_v10 = vpop.eup %1210  ;;  %913 = vst [vmem:[%s1608_s7 + $0x60] sm:$0xff] %v1209_v9 }
 0x3d4   :  { %v1213_v12 = vpop.eup %1212  ;;  %916 = vst [vmem:[%s1608_s7 + $0x78] sm:$0xff] %v1211_v10 }
 0x3d5   :  { %914 = vst [vmem:[%s1608_s7 + $0x68] sm:$0xff] %v1213_v12 }

</bundles_post_ra>
